<compile_context>
chip_gen: v6e
topology: v6e:2x2x1
jax: 0.10.0
libtpu: 0.0.40
codegen_flags: <defaults>
</compile_context>

<pallas_src>
import functools

import jax
import jax.numpy as jnp
from jax.experimental import pallas as pl
from jax.experimental.pallas import tpu as pltpu

_MIB = 1024 * 1024


def _cdiv(a, b):
    return -(-a // b)


def _vmem_capacity_bytes():
    """Per-core physical VMEM; conservative 64 MiB (v7x) fallback if the query fails."""
    try:
        cap = getattr(pltpu.get_tpu_info(), "vmem_capacity_bytes", None)
        if cap:
            return int(cap)
    except Exception:
        pass
    return 64 * _MIB


def _num_tensorcores_per_chip():
    try:
        if "v7" in jax.devices()[0].device_kind.lower():
            return 2
    except Exception:
        pass
    return 1


def _vmem_limit(footprint_bytes, capacity):
    limit = max(32 * _MIB, footprint_bytes + 8 * _MIB)
    limit = min(limit, int(0.75 * capacity))
    return int(max(limit, 16 * _MIB))


# ---------------------------------------------------------------------------
# single-pass kernel: one (Bt, C, L) slab per grid step
# ---------------------------------------------------------------------------
def _se_kernel(w1t_ref, w2t_ref, x_ref, o_ref):
    # squeeze: mean over the temporal axis, f32 accumulation; the upcast is consumed
    # immediately (no persistent f32 copy of the slab).
    z = jnp.mean(x_ref[...].astype(jnp.float32), axis=2)                       # (Bt, C)

    # excitation MLP, batched over Bt (two small f32 MXU matmuls; weights pre-transposed)
    h = jnp.maximum(jnp.dot(z, w1t_ref[...], preferred_element_type=jnp.float32), 0.0)
    s = jax.nn.sigmoid(jnp.dot(h, w2t_ref[...], preferred_element_type=jnp.float32))

    # scale: gate multiply in the I/O dtype (bf16 VALU on v6e/v7x); x is re-read from the
    # ref rather than reusing a stored f32 value.
    o_ref[...] = s.astype(o_ref.dtype)[:, :, None] * x_ref[...]


# ---------------------------------------------------------------------------
# two-pass (L-tiled) fallback for samples whose C*L working set exceeds the VMEM budget
# ---------------------------------------------------------------------------
def _se_gate_kernel(w1t_ref, w2t_ref, x_ref, s_ref, *, L_total):
    li = pl.program_id(1)

    @pl.when(li == 0)
    def _():
        s_ref[...] = jnp.zeros_like(s_ref)

    lt = x_ref.shape[2]
    lane = jax.lax.broadcasted_iota(jnp.int32, x_ref.shape, 2)
    valid = (li * lt + lane) < L_total                     # mask the padded final L tile
    xs = jnp.where(valid, x_ref[...].astype(jnp.float32), 0.0)
    s_ref[...] += jnp.sum(xs, axis=2)[:, None, :]          # accumulate sum over L tiles

    @pl.when(li == pl.num_programs(1) - 1)
    def _():
        z = s_ref[...][:, 0, :] * (1.0 / L_total)                                 # (bt, C)
        h = jnp.maximum(jnp.dot(z, w1t_ref[...], preferred_element_type=jnp.float32), 0.0)
        g = jax.nn.sigmoid(jnp.dot(h, w2t_ref[...], preferred_element_type=jnp.float32))
        s_ref[...] = g[:, None, :]


def _se_scale_kernel(s_ref, x_ref, o_ref):
    gate = s_ref[...][:, 0, :].astype(o_ref.dtype)          # (bt, C)
    o_ref[...] = gate[:, :, None] * x_ref[...]


def _squeeze_excite_1d_two_pass(x, w1t, w2t, lt, vmem_limit):
    B, C, L = x.shape
    Cr = w1t.shape[1]
    nl = _cdiv(L, lt)

    gate = pl.pallas_call(
        functools.partial(_se_gate_kernel, L_total=L),
        out_shape=jax.ShapeDtypeStruct((B, 1, C), jnp.float32),
        grid=(B, nl),
        in_specs=[
            pl.BlockSpec((C, Cr), lambda b, l: (0, 0)),
            pl.BlockSpec((Cr, C), lambda b, l: (0, 0)),
            pl.BlockSpec((1, C, lt), lambda b, l: (b, 0, l)),
        ],
        out_specs=pl.BlockSpec((1, 1, C), lambda b, l: (b, 0, 0)),
        compiler_params=pltpu.CompilerParams(
            dimension_semantics=("parallel", "arbitrary"),
            vmem_limit_bytes=vmem_limit,
        ),
    )(w1t, w2t, x)

    return pl.pallas_call(
        _se_scale_kernel,
        out_shape=jax.ShapeDtypeStruct((B, C, L), x.dtype),
        grid=(B, nl),
        in_specs=[
            pl.BlockSpec((1, 1, C), lambda b, l: (b, 0, 0)),
            pl.BlockSpec((1, C, lt), lambda b, l: (b, 0, l)),
        ],
        out_specs=pl.BlockSpec((1, C, lt), lambda b, l: (b, 0, l)),
        compiler_params=pltpu.CompilerParams(
            dimension_semantics=("parallel", "parallel"),
            vmem_limit_bytes=vmem_limit,
        ),
    )(gate, x)


# ---------------------------------------------------------------------------
# public wrapper
# ---------------------------------------------------------------------------
def squeeze_excite_1d(x, w1, w2, *, force_two_pass_lt=None):
    """x: (B, C, L); w1: (C//r, C); w2: (C, C//r). Output dtype follows x."""
    B, C, L = x.shape
    Cr = w1.shape[0]

    # Pre-transpose the tiny weights once outside the kernel (no in-kernel transpose).
    w1t = jnp.transpose(w1)      # (C, Cr)
    w2t = jnp.transpose(w2)      # (Cr, C)

    isz = jnp.dtype(x.dtype).itemsize
    # extra f32 working copy of the block is only materialized for sub-f32 inputs
    extra_f32 = 0 if jnp.dtype(x.dtype) == jnp.dtype(jnp.float32) else 4

    capacity = _vmem_capacity_bytes()
    num_tc = _num_tensorcores_per_chip()
    budget = int(0.40 * capacity)            # pipeline buffers (2x in + 2x out) + working set
    weights_bytes = 2 * 2 * C * Cr * 4

    # bytes of pipeline footprint per sample: double-buffered in + out + f32 working set
    per_sample_pipeline = C * L * (4 * isz + extra_f32)

    if force_two_pass_lt is not None or per_sample_pipeline + weights_bytes > budget:
        # A single sample does not fit the single-pass pipeline (trips first on v7x's
        # 64 MiB VMEM): two-pass L-tiled path (extra read of x is inherent to two-pass).
        if force_two_pass_lt is not None:
            lt = int(force_two_pass_lt)
        else:
            lt = (budget // max(1, C * (4 * isz + 4))) // 128 * 128
            lt = int(max(128, min(L, lt)))
        if lt >= L:
            lt = L
        footprint = C * lt * (4 * isz + 4) + weights_bytes
        return _squeeze_excite_1d_two_pass(x, w1t, w2t, lt, _vmem_limit(footprint, capacity))

    # ---- single-pass path: pick the batch tile Bt ----
    # Target x-block size: 4-8 MiB amortizes the ~0.35us/step overhead; bias larger on
    # v7x (higher HBM BW makes fixed per-step costs proportionally more expensive).
    target_x_block = 8 * _MIB if (num_tc >= 2 or capacity <= 64 * _MIB) else 6 * _MIB
    bt_target = max(1, target_x_block // (C * L * isz))
    bt_budget = max(1, (budget - weights_bytes) // per_sample_pipeline)
    bt = int(max(1, min(B, bt_target, bt_budget)))

    if num_tc >= 2 and B > 1:
        # megacore: aim for >=2 grid steps per TensorCore and an even step count
        min_steps = min(B, 2 * num_tc)
        if _cdiv(B, bt) < min_steps:
            bt = max(1, _cdiv(B, min_steps))
        nb = _cdiv(B, bt)
        if nb % 2 == 1 and nb < B:
            bt = max(1, _cdiv(B, nb + 1))
    # (single-TC parts keep the largest efficient block; no forced split)

    nb = _cdiv(B, bt)   # partial final batch block is safe: every op is per-sample, and
                        # OOB rows are never written back.
    footprint = bt * per_sample_pipeline + weights_bytes
    vmem_limit = _vmem_limit(footprint, capacity)

    # NOTE: for L that is small / not a multiple of 128, padding L (or folding dims) in
    # the wrapper would avoid lane-sparse masked stores; full-L blocks are fine here.
    cost = pl.CostEstimate(
        flops=2 * B * C * L + 4 * B * C * Cr,
        transcendentals=B * C,
        bytes_accessed=2 * B * C * L * isz + 2 * C * Cr * 4,
    )

    return pl.pallas_call(
        _se_kernel,
        out_shape=jax.ShapeDtypeStruct((B, C, L), x.dtype),
        grid=(nb,),
        in_specs=[
            pl.BlockSpec((C, Cr), lambda b: (0, 0)),        # w1^T, resident every step
            pl.BlockSpec((Cr, C), lambda b: (0, 0)),        # w2^T, resident every step
            pl.BlockSpec((bt, C, L), lambda b: (b, 0, 0)),  # (Bt, C, L) slab of x
        ],
        out_specs=pl.BlockSpec((bt, C, L), lambda b: (b, 0, 0)),
        compiler_params=pltpu.CompilerParams(
            dimension_semantics=("parallel",),
            vmem_limit_bytes=vmem_limit,
        ),
        cost_estimate=cost,
    )(w1t, w2t, x)


if __name__ == "__main__":
    B, C, L, reduction = 4, 32, 64, 16
    Cr = C // reduction

    key = jax.random.PRNGKey(0)
    kx, k1, k2, kx2 = jax.random.split(key, 4)
    x = jax.random.normal(kx, (B, C, L), dtype=jnp.float32)
    # torch.randn(channels_reduced, channels).unsqueeze(0) -> keep the squeezed 2-D weight
    w1 = jax.random.normal(k1, (Cr, C), dtype=jnp.float32)
    # torch.randn(channels, channels_reduced).unsqueeze(0)
    w2 = jax.random.normal(k2, (C, Cr), dtype=jnp.float32)

    def ref_fn(xv, w1v, w2v):
        z = jnp.mean(xv, axis=2, keepdims=True)                  # (B, C, 1)
        intermed = jax.nn.relu(jnp.matmul(w1v[None], z))         # (B, Cr, 1)
        s = jax.nn.sigmoid(jnp.matmul(w2v[None], intermed))      # (B, C, 1)
        return s * xv

    # --- single-pass path ---
    out = squeeze_excite_1d(x, w1, w2)
    jax.block_until_ready(out)
    ref = ref_fn(x, w1, w2)
    assert out.shape == (B, C, L) and out.dtype == x.dtype
    assert jnp.allclose(out, ref, atol=1e-5, rtol=1e-5)

    # --- exercise the L-tiled two-pass fallback (includes a partial final L tile) ---
    B2, L2 = 2, 320
    x2 = jax.random.normal(kx2, (B2, C, L2), dtype=jnp.float32)
    out2 = squeeze_excite_1d(x2, w1, w2, force_two_pass_lt=128)
    jax.block_until_ready(out2)
    ref2 = ref_fn(x2, w1, w2)
    assert out2.shape == (B2, C, L2) and out2.dtype == x2.dtype
    assert jnp.allclose(out2, ref2, atol=1e-5, rtol=1e-5)

    print("KERNEL_OK")
</pallas_src>

<mosaic_0001>
module attributes {stable_mosaic.version = 11 : i64} {
  func.func @_se_kernel(%arg0: i32, %arg1: memref<32x2xf32, #tpu.memory_space<vmem>>, %arg2: memref<2x32xf32, #tpu.memory_space<vmem>>, %arg3: memref<4x32x64xf32, #tpu.memory_space<vmem>>, %arg4: memref<4x32x64xf32, #tpu.memory_space<vmem>>) attributes {dimension_semantics = [#tpu.dimension_semantics<parallel>], iteration_bounds = array<i64: 1>, scalar_prefetch = 0 : i64, scratch_operands = 0 : i64, tpu.core_type = #tpu.core_type<tc>, window_params = [{pipeline_mode = #tpu.pipeline_mode<synchronous>, transform_indices = @transform_0, window_bounds = array<i64: 32, 2>}, {pipeline_mode = #tpu.pipeline_mode<synchronous>, transform_indices = @transform_1, window_bounds = array<i64: 2, 32>}, {transform_indices = @transform_2, window_bounds = array<i64: 4, 32, 64>}, {transform_indices = @transform_3, window_bounds = array<i64: 4, 32, 64>}]} {
    %c0 = arith.constant 0 : index
    %c0_0 = arith.constant 0 : index
    %c0_1 = arith.constant 0 : index
    %0 = vector.load %arg3[%c0, %c0_0, %c0_1] : memref<4x32x64xf32, #tpu.memory_space<vmem>>, vector<4x32x64xf32>
    %cst = arith.constant dense<0.000000e+00> : vector<4x32xf32>
    %1 = vector.multi_reduction <add>, %0, %cst [2] : vector<4x32x64xf32> to vector<4x32xf32>
    %cst_2 = arith.constant 6.400000e+01 : f32
    %2 = vector.broadcast %cst_2 : f32 to vector<4x32xf32>
    %3 = arith.divf %1, %2 : vector<4x32xf32>
    %c0_3 = arith.constant 0 : index
    %c0_4 = arith.constant 0 : index
    %4 = vector.load %arg1[%c0_3, %c0_4] : memref<32x2xf32, #tpu.memory_space<vmem>>, vector<32x2xf32>
    %cst_5 = arith.constant dense<0.000000e+00> : vector<4x2xf32>
    %5 = tpu.matmul %3, %4, %cst_5 {dimension_numbers = #tpu.dot_dimension_numbers<[1], [0], [0], [1], [0, 0, 1, 1], [], []>} : vector<4x32xf32>, vector<32x2xf32>, vector<4x2xf32> -> vector<4x2xf32>
    %cst_6 = arith.constant 0.000000e+00 : f32
    %6 = vector.broadcast %cst_6 : f32 to vector<4x2xf32>
    %7 = arith.maximumf %5, %6 : vector<4x2xf32>
    %c0_7 = arith.constant 0 : index
    %c0_8 = arith.constant 0 : index
    %8 = vector.load %arg2[%c0_7, %c0_8] : memref<2x32xf32, #tpu.memory_space<vmem>>, vector<2x32xf32>
    %cst_9 = arith.constant dense<0.000000e+00> : vector<4x32xf32>
    %9 = tpu.matmul %7, %8, %cst_9 {dimension_numbers = #tpu.dot_dimension_numbers<[1], [0], [0], [1], [0, 0, 1, 1], [], []>} : vector<4x2xf32>, vector<2x32xf32>, vector<4x32xf32> -> vector<4x32xf32>
    %10 = arith.negf %9 : vector<4x32xf32>
    %11 = math.exp %10 : vector<4x32xf32>
    %cst_10 = arith.constant 1.000000e+00 : f32
    %12 = vector.broadcast %cst_10 : f32 to vector<4x32xf32>
    %13 = arith.addf %12, %11 : vector<4x32xf32>
    %14 = arith.divf %12, %13 : vector<4x32xf32>
    %15 = vector.shape_cast %14 : vector<4x32xf32> to vector<4x32x1xf32>
    %c0_11 = arith.constant 0 : index
    %c0_12 = arith.constant 0 : index
    %c0_13 = arith.constant 0 : index
    %16 = vector.load %arg3[%c0_11, %c0_12, %c0_13] : memref<4x32x64xf32, #tpu.memory_space<vmem>>, vector<4x32x64xf32>
    %17 = vector.broadcast %15 : vector<4x32x1xf32> to vector<4x32x64xf32>
    %18 = arith.mulf %17, %16 : vector<4x32x64xf32>
    %c0_14 = arith.constant 0 : index
    %c0_15 = arith.constant 0 : index
    %c0_16 = arith.constant 0 : index
    %19 = vector.load %arg4[%c0_14, %c0_15, %c0_16] : memref<4x32x64xf32, #tpu.memory_space<vmem>>, vector<4x32x64xf32>
    tpu.vector_store %arg4[%c0_14, %c0_15, %c0_16], %18 {strides = array<i32>} : memref<4x32x64xf32, #tpu.memory_space<vmem>>, vector<4x32x64xf32>,
    return
  }
  func.func @transform_0(%arg0: i32) -> (i32, i32) {
    %c0_i32 = arith.constant 0 : i32
    %c0_i32_0 = arith.constant 0 : i32
    %c0_i32_1 = arith.constant 0 : i32
    return %c0_i32, %c0_i32_0 : i32, i32
  }
  func.func @transform_1(%arg0: i32) -> (i32, i32) {
    %c0_i32 = arith.constant 0 : i32
    %c0_i32_0 = arith.constant 0 : i32
    %c0_i32_1 = arith.constant 0 : i32
    return %c0_i32, %c0_i32_0 : i32, i32
  }
  func.func @transform_2(%arg0: i32) -> (i32, i32, i32) {
    %c0_i32 = arith.constant 0 : i32
    %c0_i32_0 = arith.constant 0 : i32
    %c0_i32_1 = arith.constant 0 : i32
    return %arg0, %c0_i32, %c0_i32_0 : i32, i32, i32
  }
  func.func @transform_3(%arg0: i32) -> (i32, i32, i32) {
    %c0_i32 = arith.constant 0 : i32
    %c0_i32_0 = arith.constant 0 : i32
    %c0_i32_1 = arith.constant 0 : i32
    return %arg0, %c0_i32, %c0_i32_0 : i32, i32, i32
  }
}

</mosaic_0001>

<bundles_post_ra>
// kernel: tpu_custom_call.1
= control target key start
LH: loop header
LB: loop body
LE: loop exit
PB: predicated region body
PF: predicated region fallthrough
CT: control target
= control target key end

     0   :  { %8 = vsyncpa [#allocation3], 0  ;;  %s758_s0 = inlined_call_operand.vmem [shape: f32[32,2], index: 0, kind: input, shape index: {}]   ;;  %s759_s1 = inlined_call_operand.vmem [shape: f32[2,32], index: 1, kind: input, shape index: {}]   ;;  %s760_s2 = inlined_call_operand.hbm [shape: f32[4,32,64], index: 2, kind: input, shape index: {}]   ;;  %s761_s3 = inlined_call_operand.hbm [shape: f32[4,32,64], index: 3, kind: output, shape index: {}]  }
   0x1   :  { %9 = vsyncpa [#allocation4], 0  ;;  %s586_s12 = smov [#allocation2]  }
   0x2   :  { %s19_s13 = sshll.u32 %s586_s12, 4  ;;  %s20_s13 = int_to_ptr.vmem [resolvable:$true] %s19_s13 }
   0x3   :  { %s550_s14 = scalar_lea.vmem %s20_s13, 2048  ;;  %p555_p1 = scmp.lt.s32.totalorder %s20_s13, %s20_s13 }
   0x4   :  { %p551_p0 = scmp.ne.s32.totalorder %s20_s13, %s550_s14  ;;  %p556_p2 = scmp.lt.s32.totalorder %s550_s14, %s550_s14 }
   0x6   :  { %p557_p3 = por %p556_p2, %p555_p1 }
   0x8   :  { %p558_p4 = pnand %p557_p3, %p551_p0 }
   0xa   :  { %561 = shalt.err (!%p558_p4)
}
   0xb   :  { %s587_s15 = smov 128   ;;  %s588_s16 = smov 8  }
   0xc   :  { %25 = dma.hbm_to_vmem [thread:$0]  %s760_s2, 2048, %s20_s13, [#allocation3], %s587_s15, %s587_s15, %s588_s16  }
   0xd   :  { %582 = dma.done.wait [#allocation3], 2048  }
   0xe   :  { %583 = vsyncadd [#allocation3], 4294965248  ;;  %vm45_vm0 = vcmask 523264   ;;  %v618_v0 = vld [vmem:[#allocation2 + $0x20] sm:$0xff]  ;;  %v622_v2 = vld [vmem:[#allocation2 + $0x28] sm:$0xff]  ;;  %v589_v32 = vmov 0.0   ;;  %v131_v43 = vlaneseq }
   0xf   :  { %v620_v1 = vld [vmem:[#allocation2] sm:$0xff]  ;;  %v58_v3 = vsel %vm45_vm0, %v618_v0, 0.0  ;;  %v628_v5 = vld [vmem:[#allocation2 + $0x8] sm:$0xff]  ;;  %v61_v6 = vsel %vm45_vm0, %v622_v2, 0.0  ;;  %v634_v8 = vld [vmem:[#allocation2 + $0x30] sm:$0xff]  ;;  %516 = vmatprep.subr.mxu0 %v589_v32  ;;  %527 = vmatprep.subr.mxu1 %v589_v32  ;;  %vm590_vm1 = vmmov 0  }
  0x10   :  { %v46_v4 = vsel %vm45_vm0, %v620_v1, 0.0  ;;  %59 = vadd.xlane.f32.xlu1 %v58_v3  ;;  %v49_v7 = vsel %vm45_vm0, %v628_v5, 0.0  ;;  %v636_v9 = vld [vmem:[#allocation2 + $0x10] sm:$0xff]  ;;  %v64_v10 = vsel %vm45_vm0, %v634_v8, 0.0  ;;  %v642_v12 = vld [vmem:[#allocation2 + $0x48] sm:$0xff]  ;;  %v644_v13 = vld [vmem:[#allocation2 + $0x40] sm:$0xff]  ;;  %524 = vmatprep.mubr.msk.f32.mxu0 %vm590_vm1, %v589_v32 }
  0x11   :  { %47 = vadd.xlane.f32.xlu0 %v46_v4  ;;  %v52_v11 = vsel %vm45_vm0, %v636_v9, 0.0  ;;  %v73_v14 = vsel %vm45_vm0, %v642_v12, 0.0  ;;  %v70_v15 = vsel %vm45_vm0, %v644_v13, 0.0  ;;  %v650_v16 = vld [vmem:[#allocation2 + $0x38] sm:$0xff]  ;;  %v658_v20 = vld [vmem:[#allocation2 + $0x60] sm:$0xff]  ;;  %v660_v21 = vld [vmem:[#allocation2 + $0x50] sm:$0xff]  ;;  %529 = vmatprep.mubr.msk.f32.mxu1 %vm590_vm1, %v589_v32 }
  0x12   :  { %v652_v17 = vld [vmem:[#allocation2 + $0x18] sm:$0xff]  ;;  %v67_v18 = vsel %vm45_vm0, %v650_v16, 0.0  ;;  %v82_v22 = vsel %vm45_vm0, %v658_v20, 0.0  ;;  %v76_v23 = vsel %vm45_vm0, %v660_v21, 0.0  ;;  %v668_v25 = vld [vmem:[#allocation2 + $0x68] sm:$0xff]  ;;  %v674_v28 = vld [vmem:[#allocation2 + $0x70] sm:$0xff] }
  0x13   :  { %v55_v19 = vsel %vm45_vm0, %v652_v17, 0.0  ;;  %v666_v24 = vld [vmem:[#allocation2 + $0x58] sm:$0xff]  ;;  %v85_v27 = vsel %vm45_vm0, %v668_v25, 0.0  ;;  %v88_v30 = vsel %vm45_vm0, %v674_v28, 0.0  ;;  %v113_v34 = vld [vmem:[%s758_s0 + $0x10] sm:$0xff]  ;;  %v112_v35 = vld [vmem:[%s758_s0 + $0x8] sm:$0xff] }
  0x14   :  { %62 = vadd.xlane.f32.xlu1 %v61_v6  ;;  %v79_v26 = vsel %vm45_vm0, %v666_v24, 0.0  ;;  %v676_v29 = vld [vmem:[#allocation2 + $0x78] sm:$0xff]  ;;  %v111_v36 = vld [vmem:[%s758_s0] sm:$0xff]  ;;  %v132_v46 = vand.u32 127, %v131_v43  ;;  %v694_v47 = vshrl.u32 %v131_v43, 7  ;;  %vm142_vm2 = vcmask 130112  }
  0x15   :  { %50 = vadd.xlane.f32.xlu0 %v49_v7  ;;  %v91_v31 = vsel %vm45_vm0, %v676_v29, 0.0  ;;  %v114_v33 = vld [vmem:[%s758_s0 + $0x18] sm:$0xff]  ;;  %vm149_vm3 = vcmask 195712   ;;  %vm156_vm4 = vcmask 261312   ;;  %vm215_vm5 = vcmask 1041409  }
  0x16   :  { %517 = vmatpush3.msra.mxu0 %v114_v33  ;;  %v137_v48 = vadd.s32 4294967288, %v132_v46  ;;  %v144_v49 = vadd.s32 4294967280, %v132_v46  ;;  %v135_v52 = vsub.s32 %v132_v46, %v694_v47  ;;  %v151_v53 = vadd.s32 4294967272, %v132_v46 }
  0x17   :  { %518 = vmatprep.subr.mxu0 %v589_v32  ;;  %vm217_vm6 = vcmask 1042434   ;;  %vm219_vm7 = vcmask 1043459   ;;  %vm221_vm8 = vcmask 261120   ;;  %vm300_vm9 = vcmask 1041408  }
  0x18   :  { %65 = vadd.xlane.f32.xlu1 %v64_v10  ;;  %519 = vmatpush3.msra.mxu0 %v113_v34  ;;  %v140_v55 = vsub.s32 %v137_v48, %v694_v47  ;;  %v147_v57 = vsub.s32 %v144_v49, %v694_v47  ;;  %v154_v6 = vsub.s32 %v151_v53, %v694_v47  ;;  %vm296_vm10 = vcmask 15360  }
  0x19   :  { %53 = vadd.xlane.f32.xlu0 %v52_v11  ;;  %520 = vmatprep.subr.mxu0 %v589_v32 }
  0x1a   :  { %521 = vmatpush3.msra.mxu0 %v112_v35 }
  0x1b   :  { %522 = vmatprep.subr.mxu0 %v589_v32 }
  0x1c   :  { %74 = vadd.xlane.f32.xlu1 %v73_v14  ;;  %523 = vmatpush3.msra.mxu0 %v111_v36 }
  0x1d   :  { %71 = vadd.xlane.f32.xlu0 %v70_v15 }
  0x20   :  { %68 = vadd.xlane.f32.xlu1 %v67_v18 }
  0x21   :  { %56 = vadd.xlane.f32.xlu0 %v55_v19 }
  0x24   :  { %83 = vadd.xlane.f32.xlu1 %v82_v22 }
  0x25   :  { %77 = vadd.xlane.f32.xlu0 %v76_v23 }
  0x28   :  { %80 = vadd.xlane.f32.xlu1 %v79_v26 }
  0x29   :  { %86 = vadd.xlane.f32.xlu0 %v85_v27 }
  0x2c   :  { %92 = vadd.xlane.f32.xlu1 %v91_v31 }
  0x2d   :  { %89 = vadd.xlane.f32.xlu0 %v88_v30 }
  0x99   :  { %v60_v37 = vpop.xlane.xlu1 %59 }
  0x9a   :  { %v48_v38 = vpop.xlane.xlu0 %47  ;;  %v99_v54 = vmul.f32 0.015625, %v60_v37 }
  0x9b   :  { %v95_v58 = vmul.f32 0.015625, %v48_v38 }
  0x9c   :  { %v161_v14 = vrot.slane %v99_v54, %v135_v52 }
  0x9d   :  { %v63_v39 = vpop.xlane.xlu1 %62  ;;  %v136_v18 = vrot.slane %v95_v58, %v135_v52 }
  0x9e   :  { %v51_v40 = vpop.xlane.xlu0 %50  ;;  %v100_v56 = vmul.f32 0.015625, %v63_v39 }
  0x9f   :  { %v96_v59 = vmul.f32 0.015625, %v51_v40 }
  0xa0   :  { %v165_v15 = vrot.slane %v100_v56, %v140_v55 }
  0xa1   :  { %v66_v41 = vpop.xlane.xlu1 %65  ;;  %v141_v19 = vrot.slane %v96_v59, %v140_v55 }
  0xa2   :  { %v54_v42 = vpop.xlane.xlu0 %53  ;;  %v101_v60 = vmul.f32 0.015625, %v66_v41  ;;  %v166_v38 = vsel %vm142_vm2, %v165_v15, %v161_v14 }
  0xa3   :  { %v97_v61 = vmul.f32 0.015625, %v54_v42  ;;  %v143_v40 = vsel %vm142_vm2, %v141_v19, %v136_v18  ;;  %v382_v18 = vsub.s32 0, %v694_v47 }
  0xa4   :  { %v170_v22 = vrot.slane %v101_v60, %v147_v57 }
  0xa5   :  { %v75_v44 = vpop.xlane.xlu1 %74  ;;  %v148_v23 = vrot.slane %v97_v61, %v147_v57 }
  0xa6   :  { %v72_v45 = vpop.xlane.xlu0 %71  ;;  %v104_v3 = vmul.f32 0.015625, %v75_v44  ;;  %v171_v41 = vsel %vm149_vm3, %v170_v22, %v166_v38 }
  0xa7   :  { %v103_v4 = vmul.f32 0.015625, %v72_v45  ;;  %v150_v45 = vsel %vm149_vm3, %v148_v23, %v143_v40  ;;  %v401_v23 = vsub.s32 1, %v694_v47 }
  0xa8   :  { %v184_v30 = vrot.slane %v104_v3, %v140_v55 }
  0xa9   :  { %v69_v50 = vpop.xlane.xlu1 %68  ;;  %v180_v31 = vrot.slane %v103_v4, %v135_v52 }
  0xaa   :  { %v57_v51 = vpop.xlane.xlu0 %56  ;;  %v102_v7 = vmul.f32 0.015625, %v69_v50 }
  0xab   :  { %v98_v10 = vmul.f32 0.015625, %v57_v51  ;;  %v185_v46 = vsel %vm142_vm2, %v184_v30, %v180_v31  ;;  %v439_v31 = vsub.s32 3, %v694_v47 }
  0xac   :  { %v175_v34 = vrot.slane %v102_v7, %v154_v6 }
  0xad   :  { %v84_v62 = vpop.xlane.xlu1 %83  ;;  %v155_v35 = vrot.slane %v98_v10, %v154_v6 }
  0xae   :  { %v78_v63 = vpop.xlane.xlu0 %77  ;;  %v107_v36 = vmul.f32 0.015625, %v84_v62  ;;  %v176_v50 = vsel %vm156_vm4, %v175_v34, %v171_v41 }
  0xaf   :  { %v105_v11 = vmul.f32 0.015625, %v78_v63  ;;  %v157_v51 = vsel %vm156_vm4, %v155_v35, %v150_v45 }
  0xb0   :  { %v199_v53 = vrot.slane %v107_v36, %v135_v52  ;;  %v216_v61 = vsel %vm215_vm5, %v176_v50, %v157_v51  ;;  %v295_v52 = vld [vmem:[%s759_s1] sm:$0x3]  ;;  %s591_s1 = smov [#allocation5]  }
  0xb1   :  { %v81_v26 = vpop.xlane.xlu1 %80  ;;  %v189_v37 = vrot.slane %v105_v11, %v147_v57  ;;  %528 = vmatpush3.msk.msra.mxu1 %vm300_vm9, %v295_v52  ;;  %s493_s27 = sshll.u32 %s591_s1, 4  ;;  %s494_s27 = int_to_ptr.vmem [resolvable:$true] %s493_s27 }
  0xb2   :  { %v87_v27 = vpop.xlane.xlu0 %86  ;;  %v106_v32 = vmul.f32 0.015625, %v81_v26  ;;  %s562_s28 = scalar_lea.vmem %s494_s27, 2048  ;;  %p567_p6 = scmp.lt.s32.totalorder %s494_s27, %s494_s27 }
  0xb3   :  { %v108_v33 = vmul.f32 0.015625, %v87_v27  ;;  %v190_v54 = vsel %vm149_vm3, %v189_v37, %v185_v46  ;;  %v420_v27 = vsub.s32 2, %v694_v47  ;;  %p563_p5 = scmp.ne.s32.totalorder %s494_s27, %s562_s28  ;;  %p568_p7 = scmp.lt.s32.totalorder %s562_s28, %s562_s28 }
  0xb4   :  { %v194_v39 = vrot.slane %v106_v32, %v154_v6 }
  0xb5   :  { %v203_v42 = vrot.slane %v108_v33, %v140_v55  ;;  %v93_v44 = vpop.xlane.xlu1 %92  ;;  %p569_p8 = por %p568_p7, %p567_p6 }
  0xb6   :  { %v90_v43 = vpop.xlane.xlu0 %89  ;;  %v110_v49 = vmul.f32 0.015625, %v93_v44  ;;  %v195_v56 = vsel %vm156_vm4, %v194_v39, %v190_v54 }
  0xb7   :  { %v109_v48 = vmul.f32 0.015625, %v90_v43  ;;  %v204_v59 = vsel %vm142_vm2, %v203_v42, %v199_v53  ;;  %v218_v63 = vsel %vm217_vm6, %v195_v56, %v216_v61  ;;  %p570_p9 = pnand %p569_p8, %p563_p5 }
  0xb8   :  { %v213_v55 = vrot.slane %v110_v49, %v154_v6 }
  0xb9   :  { %v208_v58 = vrot.slane %v109_v48, %v147_v57 }
  0xbb   :  { %v209_v60 = vsel %vm149_vm3, %v208_v58, %v204_v59 }
  0xbc   :  { %v214_v62 = vsel %vm156_vm4, %v213_v55, %v209_v60 }
  0xbd   :  { %v220_v3 = vsel %vm219_vm7, %v214_v62, %v218_v63 }
  0xbe   :  { %525 = vmatmul.mubr.msk.f32.vlgmr.msra.gmra.mxu0 %vm221_vm8, %v220_v3 }
 0x17e   :  { %v290_v57 = vpop.f32.mrf.mxu0 }
 0x17f   :  { %v294_v4 = vmax.f32 %v290_v57, 0.0 }
 0x180   :  { %v526_v6 = vpop.f32.mrf.mxu0 }
 0x181   :  { %530 = vmatmul.mubr.msk.f32.vlgmr.msra.gmra.mxu1 %vm296_vm10, %v294_v4 }
 0x241   :  { %v370_v7 = vpop.f32.mrf.mxu1 }
 0x242   :  { %v508_v10 = vmul.f32 -1.442695, %v370_v7 }
 0x243   :  { %v531_v11 = vpop.f32.mrf.mxu1 }
 0x244   :  { %538 = vpow2.f32 %v508_v10 }
 0x251   :  { %v539_v14 = vpop.eup %538 }
 0x252   :  { %v377_v15 = vadd.f32 1.0, %v539_v14 }
 0x254   :  { %540 = vrcp.f32 %v377_v15 }
 0x261   :  { %v541_v19 = vpop.eup %540 }
 0x262   :  { %v383_v22 = vrot.slane %v541_v19, %v382_v18  ;;  %v402_v26 = vrot.slane %v541_v19, %v401_v23  ;;  %v421_v30 = vrot.slane %v541_v19, %v420_v27  ;;  %v440_v32 = vrot.slane %v541_v19, %v439_v31 }
 0x264   :  { %389 = vbcast.lane.b32.xlu1 %v383_v22, 264  ;;  %385 = vbcast.lane.b32.xlu0 %v383_v22, 256 }
 0x268   :  { %393 = vbcast.lane.b32.xlu1 %v383_v22, 272  ;;  %404 = vbcast.lane.b32.xlu0 %v402_v26, 256 }
 0x26c   :  { %397 = vbcast.lane.b32.xlu1 %v383_v22, 280  ;;  %412 = vbcast.lane.b32.xlu0 %v402_v26, 272 }
 0x270   :  { %408 = vbcast.lane.b32.xlu1 %v402_v26, 264  ;;  %423 = vbcast.lane.b32.xlu0 %v421_v30, 256 }
 0x274   :  { %416 = vbcast.lane.b32.xlu1 %v402_v26, 280  ;;  %431 = vbcast.lane.b32.xlu0 %v421_v30, 272 }
 0x278   :  { %427 = vbcast.lane.b32.xlu1 %v421_v30, 264  ;;  %442 = vbcast.lane.b32.xlu0 %v440_v32, 256 }
 0x27c   :  { %435 = vbcast.lane.b32.xlu1 %v421_v30, 280  ;;  %450 = vbcast.lane.b32.xlu0 %v440_v32, 272 }
 0x280   :  { %446 = vbcast.lane.b32.xlu1 %v440_v32, 264 }
 0x284   :  { %454 = vbcast.lane.b32.xlu1 %v440_v32, 280 }
 0x2d6   :  { %v390_v33 = vpop.permute.xlu1 %389  ;;  %v386_v34 = vpop.permute.xlu0 %385 }
 0x2d7   :  { %v457_v35 = vmul.f32 %v390_v33, %v628_v5  ;;  %v456_v36 = vmul.f32 %v386_v34, %v620_v1 }
 0x2d9   :  { %473 = vst.msk [vmem:[#allocation5 + $0x8] sm:$0xff] %vm45_vm0, %v457_v35  ;;  %472 = vst.msk [vmem:[#allocation5] sm:$0xff] %vm45_vm0, %v456_v36 }
 0x2da   :  { %v394_v47 = vpop.permute.xlu1 %393  ;;  %v405_v37 = vpop.permute.xlu0 %404 }
 0x2db   :  { %v458_v38 = vmul.f32 %v394_v47, %v636_v9  ;;  %v460_v39 = vmul.f32 %v405_v37, %v618_v0 }
 0x2dd   :  { %474 = vst.msk [vmem:[#allocation5 + $0x10] sm:$0xff] %vm45_vm0, %v458_v38  ;;  %476 = vst.msk [vmem:[#allocation5 + $0x20] sm:$0xff] %vm45_vm0, %v460_v39 }
 0x2de   :  { %v398_v40 = vpop.permute.xlu1 %397  ;;  %v413_v41 = vpop.permute.xlu0 %412 }
 0x2df   :  { %v459_v5 = vmul.f32 %v398_v40, %v652_v17  ;;  %v462_v1 = vmul.f32 %v413_v41, %v634_v8 }
 0x2e1   :  { %475 = vst.msk [vmem:[#allocation5 + $0x18] sm:$0xff] %vm45_vm0, %v459_v5  ;;  %478 = vst.msk [vmem:[#allocation5 + $0x30] sm:$0xff] %vm45_vm0, %v462_v1 }
 0x2e2   :  { %v409_v42 = vpop.permute.xlu1 %408  ;;  %v424_v43 = vpop.permute.xlu0 %423 }
 0x2e3   :  { %v461_v9 = vmul.f32 %v409_v42, %v622_v2  ;;  %v464_v0 = vmul.f32 %v424_v43, %v644_v13 }
 0x2e5   :  { %477 = vst.msk [vmem:[#allocation5 + $0x28] sm:$0xff] %vm45_vm0, %v461_v9  ;;  %480 = vst.msk [vmem:[#allocation5 + $0x40] sm:$0xff] %vm45_vm0, %v464_v0 }
 0x2e6   :  { %v417_v44 = vpop.permute.xlu1 %416  ;;  %v432_v45 = vpop.permute.xlu0 %431 }
 0x2e7   :  { %v463_v17 = vmul.f32 %v417_v44, %v650_v16  ;;  %v466_v8 = vmul.f32 %v432_v45, %v660_v21 }
 0x2e9   :  { %479 = vst.msk [vmem:[#allocation5 + $0x38] sm:$0xff] %vm45_vm0, %v463_v17  ;;  %482 = vst.msk [vmem:[#allocation5 + $0x50] sm:$0xff] %vm45_vm0, %v466_v8 }
 0x2ea   :  { %v428_v46 = vpop.permute.xlu1 %427  ;;  %v443_v48 = vpop.permute.xlu0 %442 }
 0x2eb   :  { %v465_v2 = vmul.f32 %v428_v46, %v642_v12  ;;  %v468_v13 = vmul.f32 %v443_v48, %v658_v20 }
 0x2ed   :  { %481 = vst.msk [vmem:[#allocation5 + $0x48] sm:$0xff] %vm45_vm0, %v465_v2  ;;  %484 = vst.msk [vmem:[#allocation5 + $0x60] sm:$0xff] %vm45_vm0, %v468_v13 }
 0x2ee   :  { %v436_v49 = vpop.permute.xlu1 %435  ;;  %v451_v50 = vpop.permute.xlu0 %450 }
 0x2ef   :  { %v467_v16 = vmul.f32 %v436_v49, %v666_v24  ;;  %v470_v21 = vmul.f32 %v451_v50, %v674_v28 }
 0x2f1   :  { %483 = vst.msk [vmem:[#allocation5 + $0x58] sm:$0xff] %vm45_vm0, %v467_v16  ;;  %486 = vst.msk [vmem:[#allocation5 + $0x70] sm:$0xff] %vm45_vm0, %v470_v21 }
 0x2f2   :  { %v447_v51 = vpop.permute.xlu1 %446 }
 0x2f3   :  { %v469_v53 = vmul.f32 %v447_v51, %v668_v25 }
 0x2f5   :  { %485 = vst.msk [vmem:[#allocation5 + $0x68] sm:$0xff] %vm45_vm0, %v469_v53 }
 0x2f6   :  { %v455_v12 = vpop.permute.xlu1 %454 }
 0x2f7   :  { %v471_v20 = vmul.f32 %v455_v12, %v676_v29 }
 0x2f9   :  { %487 = vst.msk [vmem:[#allocation5 + $0x78] sm:$0xff] %vm45_vm0, %v471_v20 }
 0x2fa   :  { %573 = shalt.err (!%p570_p9)
}
 0x2fb   :  { %499 = dma.vmem_to_hbm [thread:$0]  %s494_s27, 2048, %s761_s3, [#allocation4], %s587_s15, %s587_s15, %s588_s16  }
 0x2fc   :  { %584 = dma.done.wait [#allocation4], 2048  }
 0x2fd   :  { %585 = vsyncadd [#allocation4], 4294965248 }
 0x2fe   :  { %503 = vsyncpa [#allocation3], 1 }
 0x2ff   :  { %504 = vsyncpa [#allocation4], 1 }

</bundles_post_ra>
